<compile_context>
chip_gen: v7x
topology: tpu7x:2x2x1
jax: 0.10.0
libtpu: 0.0.40
codegen_flags: <defaults>
</compile_context>

<pallas_src>
from functools import partial

import jax
import jax.numpy as jnp
from jax import lax
from jax.experimental import pallas as pl
from jax.experimental.pallas import tpu as pltpu


def _round_up(x, m):
    return -(-x // m) * m


# --------------------------------------------------------------------------
# Kernel
# --------------------------------------------------------------------------
def _mlp_kernel(x_ref,
                w1_ref, b1_ref,
                w2_ref, b2_ref,
                w3_ref, b3_ref,
                w4_ref, b4_ref,
                o_ref):
    """Fused fc1->ReLU->fc2->ReLU->fc3->ReLU->fc4 on one batch tile.

    x_ref:      [batch_tile, state_dim] f32  (native torch layout, read as-is)
    w*_ref:     [out, in] bf16 (padded), b*_ref: [out, 1] f32
    o_ref:      [action_pad, batch_tile] f32 (feature-major -> lane-dense store)

    Layer 1 contracts dim 1 of both operands (w1 @ x^T), which both switches to
    feature-major activations and avoids any wrapper-side transpose of x.  All
    matmuls are bf16 on the MXU with f32 accumulation; bias + ReLU stay f32.
    The bias broadcast ([H,1] over lanes) is a per-step lane-broadcast; with a
    1-step grid (the common case) it runs once per call, so it is not
    pre-replicated.
    """
    x = x_ref[...].astype(jnp.bfloat16)                                   # [bt, S]
    # w1 [H, S] (contract dim 1) x x [bt, S] (contract dim 1) -> [H, bt]
    h = lax.dot_general(w1_ref[...], x, (((1,), (1,)), ((), ())),
                        preferred_element_type=jnp.float32)
    h = jnp.maximum(h + b1_ref[...], 0.0).astype(jnp.bfloat16)
    h = jnp.dot(w2_ref[...], h, preferred_element_type=jnp.float32)
    h = jnp.maximum(h + b2_ref[...], 0.0).astype(jnp.bfloat16)
    h = jnp.dot(w3_ref[...], h, preferred_element_type=jnp.float32)
    h = jnp.maximum(h + b3_ref[...], 0.0).astype(jnp.bfloat16)
    out = jnp.dot(w4_ref[...], h, preferred_element_type=jnp.float32)     # [A_pad, bt]
    o_ref[...] = (out + b4_ref[...]).astype(o_ref.dtype)


# --------------------------------------------------------------------------
# Parameter preprocessing (one-time)
# --------------------------------------------------------------------------
def prepare_params(params):
    """Pad/cast PyTorch-layout params for the kernel.

    Input (nn.Linear layout): w*: [out, in] f32, b*: [out] f32.
    Output: hidden padded to a multiple of 128, action dim padded to a multiple
    of 8, weights cast to bf16, biases kept f32 as [out, 1] columns.  Zero
    padding is exact: padded rows/cols only ever multiply zero activations.
    """
    hidden, state_dim = params["w1"].shape
    action_num = params["w4"].shape[0]
    hp = _round_up(hidden, 128)
    ap = _round_up(action_num, 8)

    def pad_w(w, out_p, in_p):
        o, i = w.shape
        return jnp.pad(w, ((0, out_p - o), (0, in_p - i))).astype(jnp.bfloat16)

    def pad_b(b, out_p):
        return jnp.pad(b, (0, out_p - b.shape[0])).astype(jnp.float32)[:, None]

    return dict(
        w1=pad_w(params["w1"], hp, state_dim), b1=pad_b(params["b1"], hp),
        w2=pad_w(params["w2"], hp, hp),        b2=pad_b(params["b2"], hp),
        w3=pad_w(params["w3"], hp, hp),        b3=pad_b(params["b3"], hp),
        w4=pad_w(params["w4"], ap, hp),        b4=pad_b(params["b4"], ap),
    )


# --------------------------------------------------------------------------
# Batch-tiling heuristic
# --------------------------------------------------------------------------
_MAX_BATCH_TILE = 2048      # VMEM at tile=2048 is only a few MiB -> safe everywhere
_NUM_TC = None


def _num_tensorcores_per_chip():
    """2 on v7x (parallel grid axis shards across both TCs), else 1."""
    global _NUM_TC
    if _NUM_TC is None:
        try:
            kind = jax.devices()[0].device_kind.lower()
        except Exception:
            kind = ""
        _NUM_TC = 2 if ("v7" in kind or "tpu7" in kind or "7x" in kind) else 1
    return _NUM_TC


def _pick_batch_tile(B):
    """Largest useful tile: few grid steps, <128 rows of padding waste.

    Single-core chips (v5e/v6e): one step for B <= 2048 (tile = round_up(B,128)).
    v7x: at least 2 equal tiles so both TensorCores get work.
    """
    B8 = _round_up(B, 8)
    n_steps = -(-B8 // _MAX_BATCH_TILE)             # enough steps to cap tile size
    if B8 > 128:
        n_steps = max(n_steps, _num_tensorcores_per_chip())
    n_steps = max(n_steps, 1)
    return min(_round_up(-(-B8 // n_steps), 128), _MAX_BATCH_TILE)


# --------------------------------------------------------------------------
# Forward pass
# --------------------------------------------------------------------------
@partial(jax.jit, static_argnames=("action_num", "batch_tile"))
def _discrete_q_forward_impl(x, prep, *, action_num, batch_tile):
    B, state_dim = x.shape
    hp = prep["w1"].shape[0]
    ap = prep["w4"].shape[0]
    assert prep["w1"].shape[1] == state_dim

    assert batch_tile % 8 == 0, "batch_tile must be a multiple of 8"
    B_pad = _round_up(_round_up(B, 8), batch_tile)
    assert batch_tile % 128 == 0 or batch_tile == B_pad, (
        "batch_tile must be a multiple of 128 (lane width) unless it covers "
        "the whole (padded) batch")
    grid = (B_pad // batch_tile,)

    # Native layout, f32: the kernel does the bf16 cast + layout switch itself.
    # Under jit this pad is a single fused op (a no-op when B == B_pad).
    x_pad = jnp.pad(x, ((0, B_pad - B), (0, 0)))

    def full_spec(a):
        shape = a.shape
        # Constant index_map -> fetched once, VMEM-resident across grid steps.
        return pl.BlockSpec(shape, lambda i: (0,) * len(shape))

    in_specs = [
        pl.BlockSpec((batch_tile, state_dim), lambda i: (i, 0)),
        full_spec(prep["w1"]), full_spec(prep["b1"]),
        full_spec(prep["w2"]), full_spec(prep["b2"]),
        full_spec(prep["w3"]), full_spec(prep["b3"]),
        full_spec(prep["w4"]), full_spec(prep["b4"]),
    ]
    out_spec = pl.BlockSpec((ap, batch_tile), lambda i: (0, i))

    # Advisory cost hint so XLA can overlap this small call inside larger graphs.
    flops = 2 * B_pad * (state_dim * hp + hp * hp + hp * hp + hp * ap)
    w_bytes = sum(int(prep[k].size) * prep[k].dtype.itemsize for k in prep)
    bytes_accessed = B_pad * state_dim * 4 + w_bytes + ap * B_pad * 4
    cost = pl.CostEstimate(flops=flops, transcendentals=0,
                           bytes_accessed=bytes_accessed)

    # NOTE(v7x): "parallel" on the batch axis is what lets Mosaic shard the
    # (>=2-step) grid across both TensorCores; if an xprof trace shows it is
    # not sharding, switch to pltpu.CORE_PARALLEL on this axis.
    outT = pl.pallas_call(
        _mlp_kernel,
        out_shape=jax.ShapeDtypeStruct((ap, B_pad), jnp.float32),
        grid_spec=pltpu.PrefetchScalarGridSpec(
            num_scalar_prefetch=0,
            grid=grid,
            in_specs=in_specs,
            out_specs=out_spec,
        ),
        compiler_params=pltpu.CompilerParams(
            dimension_semantics=("parallel",)),
        cost_estimate=cost,
    )(x_pad,
      prep["w1"], prep["b1"],
      prep["w2"], prep["b2"],
      prep["w3"], prep["b3"],
      prep["w4"], prep["b4"])

    # Back to [B, action_num]; under jit this slice+transpose fuses to one op.
    return outT[:action_num, :B].T


def discrete_q_forward(x, prep, action_num, *, batch_tile=None):
    """Pallas TPU forward pass of DiscreteQ.

    x: [B, state_dim] f32; prep: output of prepare_params.
    Returns [B, action_num] f32.
    """
    if batch_tile is None:
        batch_tile = _pick_batch_tile(x.shape[0])
    return _discrete_q_forward_impl(x, prep, action_num=action_num,
                                    batch_tile=batch_tile)


# --------------------------------------------------------------------------
# Init + references (for the self-test)
# --------------------------------------------------------------------------
def init_params(key, state_dim, action_num, hidden_size=64, dtype=jnp.float32):
    """Synthetic init matching nn.Linear (weights [out, in], biases [out])."""
    def linear_init(k, fan_in, fan_out):
        kw, kb = jax.random.split(k)
        bound = float(1.0 / (fan_in ** 0.5))
        w = jax.random.uniform(kw, (fan_out, fan_in), dtype, -bound, bound)
        b = jax.random.uniform(kb, (fan_out,), dtype, -bound, bound)
        return w, b

    k1, k2, k3, k4 = jax.random.split(key, 4)
    w1, b1 = linear_init(k1, state_dim, hidden_size)
    w2, b2 = linear_init(k2, hidden_size, hidden_size)
    w3, b3 = linear_init(k3, hidden_size, hidden_size)
    w4, b4 = linear_init(k4, hidden_size, action_num)
    return dict(w1=w1, b1=b1, w2=w2, b2=b2, w3=w3, b3=b3, w4=w4, b4=b4)


def reference_forward(x, p):
    """Pure-f32 reference (PyTorch semantics: y = x @ W.T + b)."""
    h = jnp.maximum(x @ p["w1"].T + p["b1"], 0.0)
    h = jnp.maximum(h @ p["w2"].T + p["b2"], 0.0)
    h = jnp.maximum(h @ p["w3"].T + p["b3"], 0.0)
    return h @ p["w4"].T + p["b4"]


def reference_forward_mixed(x, prep, action_num):
    """Same mixed-precision recipe as the kernel, in plain jnp (tight check)."""
    h = x.T.astype(jnp.bfloat16)
    for wi, bi in (("w1", "b1"), ("w2", "b2"), ("w3", "b3")):
        h = jnp.dot(prep[wi], h, preferred_element_type=jnp.float32) + prep[bi]
        h = jnp.maximum(h, 0.0).astype(jnp.bfloat16)
    out = jnp.dot(prep["w4"], h, preferred_element_type=jnp.float32) + prep["b4"]
    return out[:action_num, :].T


# NOTE: x and hidden activations run in bf16 (f32 accumulation); results match
# the pure-f32 PyTorch reference to ~5e-2, which can flip argmax(Q) on
# near-tied actions.  Keep x/h in f32 end-to-end if that matters downstream.

if __name__ == "__main__":
    key = jax.random.PRNGKey(0)
    k_params, k_x = jax.random.split(key)

    state_dim, action_num, hidden = 32, 6, 64
    params = init_params(k_params, state_dim, action_num, hidden)
    prep = prepare_params(params)

    # batch=8   : tiny single-step path (tile=128, padded lanes)
    # batch=300 : single step, tile=384 (low padding waste) on v5e/v6e;
    #             2x256 tiles on v7x (both TensorCores)
    # batch=2500: multi-step grid path (tile capped, >=2 steps)
    for batch in (8, 300, 2500):
        kx = jax.random.fold_in(k_x, batch)
        x = jax.random.normal(kx, (batch, state_dim), jnp.float32)

        out = jax.block_until_ready(discrete_q_forward(x, prep, action_num))
        assert out.shape == (batch, action_num)

        ref_mp = reference_forward_mixed(x, prep, action_num)   # same bf16 recipe
        ref_32 = reference_forward(x, params)                   # pure f32 reference
        assert jnp.allclose(out, ref_mp, atol=2e-3, rtol=2e-3), "mixed-precision mismatch"
        assert jnp.allclose(out, ref_32, atol=5e-2, rtol=5e-2), "f32 reference mismatch"

    print("KERNEL_OK")
</pallas_src>

<mosaic_0001>
module attributes {stable_mosaic.version = 11 : i64} {
  func.func @_mlp_kernel(%arg0: i32, %arg1: memref<128x32xf32, #tpu.memory_space<vmem>>, %arg2: memref<128x32xbf16, #tpu.memory_space<vmem>>, %arg3: memref<128x1xf32, #tpu.memory_space<vmem>>, %arg4: memref<128x128xbf16, #tpu.memory_space<vmem>>, %arg5: memref<128x1xf32, #tpu.memory_space<vmem>>, %arg6: memref<128x128xbf16, #tpu.memory_space<vmem>>, %arg7: memref<128x1xf32, #tpu.memory_space<vmem>>, %arg8: memref<8x128xbf16, #tpu.memory_space<vmem>>, %arg9: memref<8x1xf32, #tpu.memory_space<vmem>>, %arg10: memref<8x128xf32, #tpu.memory_space<vmem>>) attributes {dimension_semantics = [#tpu.dimension_semantics<parallel>], iteration_bounds = array<i64: 1>, scalar_prefetch = 0 : i64, scratch_operands = 0 : i64, tpu.core_type = #tpu.core_type<tc>, window_params = [{transform_indices = @transform_0, window_bounds = array<i64: 128, 32>}, {pipeline_mode = #tpu.pipeline_mode<synchronous>, transform_indices = @transform_1, window_bounds = array<i64: 128, 32>}, {pipeline_mode = #tpu.pipeline_mode<synchronous>, transform_indices = @transform_2, window_bounds = array<i64: 128, 1>}, {pipeline_mode = #tpu.pipeline_mode<synchronous>, transform_indices = @transform_3, window_bounds = array<i64: 128, 128>}, {pipeline_mode = #tpu.pipeline_mode<synchronous>, transform_indices = @transform_4, window_bounds = array<i64: 128, 1>}, {pipeline_mode = #tpu.pipeline_mode<synchronous>, transform_indices = @transform_5, window_bounds = array<i64: 128, 128>}, {pipeline_mode = #tpu.pipeline_mode<synchronous>, transform_indices = @transform_6, window_bounds = array<i64: 128, 1>}, {pipeline_mode = #tpu.pipeline_mode<synchronous>, transform_indices = @transform_7, window_bounds = array<i64: 8, 128>}, {pipeline_mode = #tpu.pipeline_mode<synchronous>, transform_indices = @transform_8, window_bounds = array<i64: 8, 1>}, {transform_indices = @transform_9, window_bounds = array<i64: 8, 128>}]} {
    %c0 = arith.constant 0 : index
    %c0_0 = arith.constant 0 : index
    %0 = vector.load %arg1[%c0, %c0_0] : memref<128x32xf32, #tpu.memory_space<vmem>>, vector<128x32xf32>
    %1 = arith.truncf %0 : vector<128x32xf32> to vector<128x32xbf16>
    %c0_1 = arith.constant 0 : index
    %c0_2 = arith.constant 0 : index
    %2 = vector.load %arg2[%c0_1, %c0_2] : memref<128x32xbf16, #tpu.memory_space<vmem>>, vector<128x32xbf16>
    %cst = arith.constant dense<0.000000e+00> : vector<128x128xf32>
    %3 = tpu.matmul %2, %1, %cst {dimension_numbers = #tpu.dot_dimension_numbers<[1], [1], [0], [0], [0, 0, 1, 0], [], []>} : vector<128x32xbf16>, vector<128x32xbf16>, vector<128x128xf32> -> vector<128x128xf32>
    %c0_3 = arith.constant 0 : index
    %c0_4 = arith.constant 0 : index
    %4 = vector.load %arg3[%c0_3, %c0_4] : memref<128x1xf32, #tpu.memory_space<vmem>>, vector<128x1xf32>
    %5 = vector.broadcast %4 : vector<128x1xf32> to vector<128x128xf32>
    %6 = arith.addf %3, %5 : vector<128x128xf32>
    %cst_5 = arith.constant 0.000000e+00 : f32
    %7 = vector.broadcast %cst_5 : f32 to vector<128x128xf32>
    %8 = arith.maximumf %6, %7 : vector<128x128xf32>
    %9 = arith.truncf %8 : vector<128x128xf32> to vector<128x128xbf16>
    %c0_6 = arith.constant 0 : index
    %c0_7 = arith.constant 0 : index
    %10 = vector.load %arg4[%c0_6, %c0_7] : memref<128x128xbf16, #tpu.memory_space<vmem>>, vector<128x128xbf16>
    %cst_8 = arith.constant dense<0.000000e+00> : vector<128x128xf32>
    %11 = tpu.matmul %10, %9, %cst_8 {dimension_numbers = #tpu.dot_dimension_numbers<[1], [0], [0], [1], [0, 0, 1, 1], [], []>} : vector<128x128xbf16>, vector<128x128xbf16>, vector<128x128xf32> -> vector<128x128xf32>
    %c0_9 = arith.constant 0 : index
    %c0_10 = arith.constant 0 : index
    %12 = vector.load %arg5[%c0_9, %c0_10] : memref<128x1xf32, #tpu.memory_space<vmem>>, vector<128x1xf32>
    %13 = vector.broadcast %12 : vector<128x1xf32> to vector<128x128xf32>
    %14 = arith.addf %11, %13 : vector<128x128xf32>
    %cst_11 = arith.constant 0.000000e+00 : f32
    %15 = vector.broadcast %cst_11 : f32 to vector<128x128xf32>
    %16 = arith.maximumf %14, %15 : vector<128x128xf32>
    %17 = arith.truncf %16 : vector<128x128xf32> to vector<128x128xbf16>
    %c0_12 = arith.constant 0 : index
    %c0_13 = arith.constant 0 : index
    %18 = vector.load %arg6[%c0_12, %c0_13] : memref<128x128xbf16, #tpu.memory_space<vmem>>, vector<128x128xbf16>
    %cst_14 = arith.constant dense<0.000000e+00> : vector<128x128xf32>
    %19 = tpu.matmul %18, %17, %cst_14 {dimension_numbers = #tpu.dot_dimension_numbers<[1], [0], [0], [1], [0, 0, 1, 1], [], []>} : vector<128x128xbf16>, vector<128x128xbf16>, vector<128x128xf32> -> vector<128x128xf32>
    %c0_15 = arith.constant 0 : index
    %c0_16 = arith.constant 0 : index
    %20 = vector.load %arg7[%c0_15, %c0_16] : memref<128x1xf32, #tpu.memory_space<vmem>>, vector<128x1xf32>
    %21 = vector.broadcast %20 : vector<128x1xf32> to vector<128x128xf32>
    %22 = arith.addf %19, %21 : vector<128x128xf32>
    %cst_17 = arith.constant 0.000000e+00 : f32
    %23 = vector.broadcast %cst_17 : f32 to vector<128x128xf32>
    %24 = arith.maximumf %22, %23 : vector<128x128xf32>
    %25 = arith.truncf %24 : vector<128x128xf32> to vector<128x128xbf16>
    %c0_18 = arith.constant 0 : index
    %c0_19 = arith.constant 0 : index
    %26 = vector.load %arg8[%c0_18, %c0_19] : memref<8x128xbf16, #tpu.memory_space<vmem>>, vector<8x128xbf16>
    %cst_20 = arith.constant dense<0.000000e+00> : vector<8x128xf32>
    %27 = tpu.matmul %26, %25, %cst_20 {dimension_numbers = #tpu.dot_dimension_numbers<[1], [0], [0], [1], [0, 0, 1, 1], [], []>} : vector<8x128xbf16>, vector<128x128xbf16>, vector<8x128xf32> -> vector<8x128xf32>
    %c0_21 = arith.constant 0 : index
    %c0_22 = arith.constant 0 : index
    %28 = vector.load %arg9[%c0_21, %c0_22] : memref<8x1xf32, #tpu.memory_space<vmem>>, vector<8x1xf32>
    %29 = vector.broadcast %28 : vector<8x1xf32> to vector<8x128xf32>
    %30 = arith.addf %27, %29 : vector<8x128xf32>
    %c0_23 = arith.constant 0 : index
    %c0_24 = arith.constant 0 : index
    %31 = vector.load %arg10[%c0_23, %c0_24] : memref<8x128xf32, #tpu.memory_space<vmem>>, vector<8x128xf32>
    tpu.vector_store %arg10[%c0_23, %c0_24], %30 {strides = array<i32>} : memref<8x128xf32, #tpu.memory_space<vmem>>, vector<8x128xf32>,
    return
  }
  func.func @transform_0(%arg0: i32) -> (i32, i32) {
    %c0_i32 = arith.constant 0 : i32
    %c0_i32_0 = arith.constant 0 : i32
    return %arg0, %c0_i32 : i32, i32
  }
  func.func @transform_1(%arg0: i32) -> (i32, i32) {
    %c0_i32 = arith.constant 0 : i32
    %c0_i32_0 = arith.constant 0 : i32
    %c0_i32_1 = arith.constant 0 : i32
    return %c0_i32, %c0_i32_0 : i32, i32
  }
  func.func @transform_2(%arg0: i32) -> (i32, i32) {
    %c0_i32 = arith.constant 0 : i32
    %c0_i32_0 = arith.constant 0 : i32
    %c0_i32_1 = arith.constant 0 : i32
    return %c0_i32, %c0_i32_0 : i32, i32
  }
  func.func @transform_3(%arg0: i32) -> (i32, i32) {
    %c0_i32 = arith.constant 0 : i32
    %c0_i32_0 = arith.constant 0 : i32
    %c0_i32_1 = arith.constant 0 : i32
    return %c0_i32, %c0_i32_0 : i32, i32
  }
  func.func @transform_4(%arg0: i32) -> (i32, i32) {
    %c0_i32 = arith.constant 0 : i32
    %c0_i32_0 = arith.constant 0 : i32
    %c0_i32_1 = arith.constant 0 : i32
    return %c0_i32, %c0_i32_0 : i32, i32
  }
  func.func @transform_5(%arg0: i32) -> (i32, i32) {
    %c0_i32 = arith.constant 0 : i32
    %c0_i32_0 = arith.constant 0 : i32
    %c0_i32_1 = arith.constant 0 : i32
    return %c0_i32, %c0_i32_0 : i32, i32
  }
  func.func @transform_6(%arg0: i32) -> (i32, i32) {
    %c0_i32 = arith.constant 0 : i32
    %c0_i32_0 = arith.constant 0 : i32
    %c0_i32_1 = arith.constant 0 : i32
    return %c0_i32, %c0_i32_0 : i32, i32
  }
  func.func @transform_7(%arg0: i32) -> (i32, i32) {
    %c0_i32 = arith.constant 0 : i32
    %c0_i32_0 = arith.constant 0 : i32
    %c0_i32_1 = arith.constant 0 : i32
    return %c0_i32, %c0_i32_0 : i32, i32
  }
  func.func @transform_8(%arg0: i32) -> (i32, i32) {
    %c0_i32 = arith.constant 0 : i32
    %c0_i32_0 = arith.constant 0 : i32
    %c0_i32_1 = arith.constant 0 : i32
    return %c0_i32, %c0_i32_0 : i32, i32
  }
  func.func @transform_9(%arg0: i32) -> (i32, i32) {
    %c0_i32 = arith.constant 0 : i32
    %c0_i32_0 = arith.constant 0 : i32
    return %c0_i32, %arg0 : i32, i32
  }
}

</mosaic_0001>

<bundles_post_ra>
// kernel: _discrete_q_forward_impl.1
= control target key start
LH: loop header
LB: loop body
LE: loop exit
PB: predicated region body
PF: predicated region fallthrough
CT: control target
= control target key end

     0   :  { %vm209_vm0 = vcmask 261120   ;;  %v1235_v3 = vmov 0   ;;  %vm1237_vm1 = vmmov 0   ;;  %s1594_s0 = inlined_call_operand.vmem [shape: f32[128,32], index: 0, kind: input, shape index: {}]   ;;  %s1595_s2 = inlined_call_operand.vmem [shape: f32[128,1], index: 2, kind: input, shape index: {}]   ;;  %s1596_s1 = inlined_call_operand.vmem [shape: bf16[128,32], index: 1, kind: input, shape index: {}]   ;;  %s1597_s4 = inlined_call_operand.vmem [shape: f32[128,1], index: 4, kind: input, shape index: {}]   ;;  %s1598_s6 = inlined_call_operand.vmem [shape: f32[128,1], index: 6, kind: input, shape index: {}]   ;;  %s1599_s8 = inlined_call_operand.vmem [shape: f32[8,1], index: 8, kind: input, shape index: {}]   ;;  %s1600_s3 = inlined_call_operand.vmem [shape: bf16[128,128], index: 3, kind: input, shape index: {}]   ;;  %s1601_s5 = inlined_call_operand.vmem [shape: bf16[128,128], index: 5, kind: input, shape index: {}]   ;;  %s1602_s7 = inlined_call_operand.vmem [shape: bf16[8,128], index: 7, kind: input, shape index: {}]   ;;  %s1603_s9 = inlined_call_operand.vmem [shape: f32[8,128], index: 9, kind: output, shape index: {}]  }
   0x1   :  { %v33_v0 = vld [vmem:[%s1594_s0] sm:$0xff]  ;;  %v34_v1 = vld [vmem:[%s1594_s0 + $0x8] sm:$0xff]  ;;  %v35_v2 = vld [vmem:[%s1594_s0 + $0x10] sm:$0xff]  ;;  %1209 = vset.pattern.permute.xlu0 %v1235_v3  ;;  %1210 = vset.pattern.permute.xlu1 %v1235_v3 }
   0x2   :  { %v49_v4 = vpack.c.bf16 %v34_v1, %v33_v0  ;;  %v36_v5 = vld [vmem:[%s1594_s0 + $0x18] sm:$0xff]  ;;  %v73_v8 = vld [vmem:[%s1595_s2] sm:$0xff]  ;;  %v38_v10 = vld [vmem:[%s1594_s0 + $0x28] sm:$0xff] }
   0x3   :  { %v50_v6 = vpack.c.bf16 %v36_v5, %v35_v2  ;;  %v37_v9 = vld [vmem:[%s1594_s0 + $0x20] sm:$0xff]  ;;  %91 = vperm.xlu0 %1209, %v73_v8   ;;  %v74_v11 = vld [vmem:[%s1595_s2 + $0x8] sm:$0xff]  ;;  %v75_v12 = vld [vmem:[%s1595_s2 + $0x10] sm:$0xff] }
   0x4   :  { %1198 = vmatprep.subr.msk.bf16.mxu0 %vm209_vm0, %v49_v4  ;;  %v235_v7 = vsel %vm209_vm0, %v49_v4, 0  ;;  %101 = vperm.xlu1 %1210, %v75_v12   ;;  %v76_v13 = vld [vmem:[%s1595_s2 + $0x18] sm:$0xff]  ;;  %v1211_v14 = vld [vmem:[%s1596_s1] sm:$0xff]   ;;  %v51_v16 = vpack.c.bf16 %v38_v10, %v37_v9  ;;  %v78_v18 = vld [vmem:[%s1595_s2 + $0x28] sm:$0xff] }
   0x5   :  { %1083 = vmatpush3.bf16.xpose.msra.mxu0 %v235_v7  ;;  %v238_v15 = vsel %vm209_vm0, %v50_v6, 0  ;;  %v77_v17 = vld [vmem:[%s1595_s2 + $0x20] sm:$0xff]  ;;  %1098 = vmatprep.mubr.msk.bf16.mxu0 %vm209_vm0, %v1211_v14  ;;  %v39_v19 = vld [vmem:[%s1594_s0 + $0x30] sm:$0xff]  ;;  %v40_v20 = vld [vmem:[%s1594_s0 + $0x38] sm:$0xff] }
   0x6   :  { %1199 = vmatprep.subr.msk.bf16.mxu0 %vm209_vm0, %v50_v6  ;;  %v79_v21 = vld [vmem:[%s1595_s2 + $0x30] sm:$0xff]  ;;  %v80_v22 = vld [vmem:[%s1595_s2 + $0x38] sm:$0xff]  ;;  %v241_v23 = vsel %vm209_vm0, %v51_v16, 0  ;;  %v52_v24 = vpack.c.bf16 %v40_v20, %v39_v19  ;;  %v81_v25 = vld [vmem:[%s1595_s2 + $0x40] sm:$0xff] }
   0x7   :  { %96 = vperm.xlu0 %1209, %v74_v11   ;;  %v82_v26 = vld [vmem:[%s1595_s2 + $0x48] sm:$0xff]  ;;  %v41_v27 = vld [vmem:[%s1594_s0 + $0x40] sm:$0xff]  ;;  %v83_v29 = vld [vmem:[%s1595_s2 + $0x50] sm:$0xff] }
   0x8   :  { %106 = vperm.xlu1 %1210, %v76_v13   ;;  %v42_v28 = vld [vmem:[%s1594_s0 + $0x48] sm:$0xff]  ;;  %v84_v30 = vld [vmem:[%s1595_s2 + $0x58] sm:$0xff]  ;;  %v244_v31 = vsel %vm209_vm0, %v52_v24, 0  ;;  %v85_v33 = vld [vmem:[%s1595_s2 + $0x60] sm:$0xff] }
   0x9   :  { %v53_v32 = vpack.c.bf16 %v42_v28, %v41_v27  ;;  %v86_v34 = vld [vmem:[%s1595_s2 + $0x68] sm:$0xff]  ;;  %v43_v35 = vld [vmem:[%s1594_s0 + $0x50] sm:$0xff]  ;;  %v44_v36 = vld [vmem:[%s1594_s0 + $0x58] sm:$0xff] }
   0xa   :  { %v87_v37 = vld [vmem:[%s1595_s2 + $0x70] sm:$0xff]  ;;  %v88_v38 = vld [vmem:[%s1595_s2 + $0x78] sm:$0xff]  ;;  %v54_v40 = vpack.c.bf16 %v44_v36, %v43_v35  ;;  %v395_v41 = vld [vmem:[%s1597_s4] sm:$0xff] }
   0xb   :  { %111 = vperm.xlu0 %1209, %v77_v17   ;;  %v247_v39 = vsel %vm209_vm0, %v53_v32, 0  ;;  %v396_v42 = vld [vmem:[%s1597_s4 + $0x8] sm:$0xff]  ;;  %v45_v43 = vld [vmem:[%s1594_s0 + $0x60] sm:$0xff]  ;;  %v397_v45 = vld [vmem:[%s1597_s4 + $0x10] sm:$0xff] }
   0xc   :  { %116 = vperm.xlu1 %1210, %v78_v18   ;;  %v46_v44 = vld [vmem:[%s1594_s0 + $0x68] sm:$0xff]  ;;  %v398_v46 = vld [vmem:[%s1597_s4 + $0x18] sm:$0xff]  ;;  %v250_v47 = vsel %vm209_vm0, %v54_v40, 0  ;;  %v399_v49 = vld [vmem:[%s1597_s4 + $0x20] sm:$0xff] }
   0xd   :  { %1085 = vmatpush3.bf16.xpose.msra.mxu0 %v238_v15  ;;  %v55_v48 = vpack.c.bf16 %v46_v44, %v45_v43  ;;  %v400_v50 = vld [vmem:[%s1597_s4 + $0x28] sm:$0xff]  ;;  %v47_v51 = vld [vmem:[%s1594_s0 + $0x70] sm:$0xff]  ;;  %v48_v52 = vld [vmem:[%s1594_s0 + $0x78] sm:$0xff] }
   0xe   :  { %1200 = vmatprep.subr.msk.bf16.mxu0 %vm209_vm0, %v51_v16  ;;  %v401_v53 = vld [vmem:[%s1597_s4 + $0x30] sm:$0xff]  ;;  %v402_v54 = vld [vmem:[%s1597_s4 + $0x38] sm:$0xff]  ;;  %v56_v56 = vpack.c.bf16 %v48_v52, %v47_v51  ;;  %v403_v57 = vld [vmem:[%s1597_s4 + $0x40] sm:$0xff] }
   0xf   :  { %121 = vperm.xlu0 %1209, %v79_v21   ;;  %v253_v55 = vsel %vm209_vm0, %v55_v48, 0  ;;  %v404_v58 = vld [vmem:[%s1597_s4 + $0x48] sm:$0xff]  ;;  %v405_v59 = vld [vmem:[%s1597_s4 + $0x50] sm:$0xff]  ;;  %v406_v60 = vld [vmem:[%s1597_s4 + $0x58] sm:$0xff] }
  0x10   :  { %126 = vperm.xlu1 %1210, %v80_v22   ;;  %v256_v61 = vsel %vm209_vm0, %v56_v56, 0  ;;  %v407_v62 = vld [vmem:[%s1597_s4 + $0x60] sm:$0xff]  ;;  %v408_v63 = vld [vmem:[%s1597_s4 + $0x68] sm:$0xff]  ;;  %v409_v0 = vld [vmem:[%s1597_s4 + $0x70] sm:$0xff] }
  0x11   :  { %v1212_v1 = vld [vmem:[%s1596_s1 + $0x8] sm:$0xff]   ;;  %v1213_v2 = vld [vmem:[%s1596_s1 + $0x10] sm:$0xff]   ;;  %v410_v3 = vld [vmem:[%s1597_s4 + $0x78] sm:$0xff] }
  0x12   :  { %v676_v4 = vld [vmem:[%s1598_s6] sm:$0xff]  ;;  %v677_v5 = vld [vmem:[%s1598_s6 + $0x8] sm:$0xff]  ;;  %v678_v6 = vld [vmem:[%s1598_s6 + $0x10] sm:$0xff] }
  0x13   :  { %131 = vperm.xlu0 %1209, %v81_v25   ;;  %v1214_v7 = vld [vmem:[%s1596_s1 + $0x18] sm:$0xff]   ;;  %v1215_v8 = vld [vmem:[%s1596_s1 + $0x20] sm:$0xff]   ;;  %v681_v11 = vld [vmem:[%s1598_s6 + $0x28] sm:$0xff] }
  0x14   :  { %136 = vperm.xlu1 %1210, %v82_v26   ;;  %v679_v9 = vld [vmem:[%s1598_s6 + $0x18] sm:$0xff]  ;;  %v680_v10 = vld [vmem:[%s1598_s6 + $0x20] sm:$0xff]  ;;  %v682_v12 = vld [vmem:[%s1598_s6 + $0x30] sm:$0xff] }
  0x15   :  { %1087 = vmatpush3.bf16.xpose.msra.mxu0 %v241_v23  ;;  %v1216_v13 = vld [vmem:[%s1596_s1 + $0x28] sm:$0xff]   ;;  %v1217_v14 = vld [vmem:[%s1596_s1 + $0x30] sm:$0xff]   ;;  %v683_v15 = vld [vmem:[%s1598_s6 + $0x38] sm:$0xff] }
  0x16   :  { %1201 = vmatprep.subr.msk.bf16.mxu0 %vm209_vm0, %v52_v24  ;;  %v684_v16 = vld [vmem:[%s1598_s6 + $0x40] sm:$0xff]  ;;  %v685_v17 = vld [vmem:[%s1598_s6 + $0x48] sm:$0xff]  ;;  %v686_v18 = vld [vmem:[%s1598_s6 + $0x50] sm:$0xff] }
  0x17   :  { %141 = vperm.xlu0 %1209, %v83_v29   ;;  %v1218_v19 = vld [vmem:[%s1596_s1 + $0x38] sm:$0xff]   ;;  %v688_v21 = vld [vmem:[%s1598_s6 + $0x60] sm:$0xff]  ;;  %v689_v22 = vld [vmem:[%s1598_s6 + $0x68] sm:$0xff] }
  0x18   :  { %146 = vperm.xlu1 %1210, %v84_v30   ;;  %v687_v20 = vld [vmem:[%s1598_s6 + $0x58] sm:$0xff]  ;;  %v690_v23 = vld [vmem:[%s1598_s6 + $0x70] sm:$0xff]  ;;  %v942_v25 = vld [vmem:[%s1599_s8] sm:$0xff] }
  0x19   :  { %v691_v24 = vld [vmem:[%s1598_s6 + $0x78] sm:$0xff]  ;;  %v1219_v26 = vld [vmem:[%s1600_s3] sm:$0xff]  }
  0x1a   :  { %1130 = vmatprep.mubr.bf16.mxu1 %v1219_v26 }
  0x1b   :  { %151 = vperm.xlu0 %1209, %v85_v33  }
  0x1c   :  { %156 = vperm.xlu1 %1210, %v86_v34  }
  0x1d   :  { %1089 = vmatpush3.bf16.xpose.msra.mxu0 %v244_v31 }
  0x1e   :  { %1202 = vmatprep.subr.msk.bf16.mxu0 %vm209_vm0, %v53_v32 }
  0x1f   :  { %161 = vperm.xlu0 %1209, %v87_v37  }
  0x20   :  { %166 = vperm.xlu1 %1210, %v88_v38  }
  0x23   :  { %413 = vperm.xlu0 %1209, %v395_v41  }
  0x24   :  { %418 = vperm.xlu1 %1210, %v396_v42  }
  0x25   :  { %1091 = vmatpush3.bf16.xpose.msra.mxu0 %v247_v39 }
  0x26   :  { %1203 = vmatprep.subr.msk.bf16.mxu0 %vm209_vm0, %v54_v40 }
  0x27   :  { %423 = vperm.xlu0 %1209, %v397_v45  }
  0x28   :  { %428 = vperm.xlu1 %1210, %v398_v46  }
  0x2b   :  { %433 = vperm.xlu0 %1209, %v399_v49  }
  0x2c   :  { %438 = vperm.xlu1 %1210, %v400_v50  }
  0x2d   :  { %1093 = vmatpush3.bf16.xpose.msra.mxu0 %v250_v47 }
  0x2e   :  { %1204 = vmatprep.subr.msk.bf16.mxu0 %vm209_vm0, %v55_v48 }
  0x2f   :  { %443 = vperm.xlu0 %1209, %v401_v53  }
  0x30   :  { %448 = vperm.xlu1 %1210, %v402_v54  }
  0x33   :  { %453 = vperm.xlu0 %1209, %v403_v57  }
  0x34   :  { %458 = vperm.xlu1 %1210, %v404_v58  }
  0x35   :  { %1095 = vmatpush3.bf16.xpose.msra.mxu0 %v253_v55 }
  0x36   :  { %1205 = vmatprep.subr.msk.bf16.mxu0 %vm209_vm0, %v56_v56 }
  0x37   :  { %463 = vperm.xlu0 %1209, %v405_v59  }
  0x38   :  { %468 = vperm.xlu1 %1210, %v406_v60  }
  0x3b   :  { %473 = vperm.xlu0 %1209, %v407_v62  }
  0x3c   :  { %478 = vperm.xlu1 %1210, %v408_v63  }
  0x3d   :  { %1097 = vmatpush3.bf16.xpose.msra.mxu0 %v256_v61 }
  0x3f   :  { %483 = vperm.xlu0 %1209, %v409_v0  }
  0x40   :  { %488 = vperm.xlu1 %1210, %v410_v3  }
  0x43   :  { %694 = vperm.xlu0 %1209, %v676_v4  }
  0x44   :  { %1099 = vmatmul.mubr.msk.bf16.vlgmr.msra.gmra.mrb[0].mxu0 %vm209_vm0, %v1212_v1  ;;  %699 = vperm.xlu1 %1210, %v677_v5  }
  0x45   :  { %1102 = vmatprep.mubr.msk.bf16.mxu0 %vm209_vm0, %v1213_v2 }
  0x47   :  { %704 = vperm.xlu0 %1209, %v678_v6  }
  0x48   :  { %709 = vperm.xlu1 %1210, %v679_v9  }
  0x4b   :  { %714 = vperm.xlu0 %1209, %v680_v10  }
  0x4c   :  { %1103 = vmatmul.mubr.msk.bf16.gmra.mrb[4].mxu0 %vm209_vm0, %v1214_v7  ;;  %719 = vperm.xlu1 %1210, %v681_v11  }
  0x4d   :  { %1106 = vmatprep.mubr.msk.bf16.mxu0 %vm209_vm0, %v1215_v8 }
  0x4f   :  { %724 = vperm.xlu0 %1209, %v682_v12  }
  0x50   :  { %729 = vperm.xlu1 %1210, %v683_v15  }
  0x53   :  { %734 = vperm.xlu0 %1209, %v684_v16  }
  0x54   :  { %1107 = vmatmul.mubr.msk.bf16.gmra.mrb[8].mxu0 %vm209_vm0, %v1216_v13  ;;  %739 = vperm.xlu1 %1210, %v685_v17  }
  0x55   :  { %1110 = vmatprep.mubr.msk.bf16.mxu0 %vm209_vm0, %v1217_v14 }
  0x57   :  { %744 = vperm.xlu0 %1209, %v686_v18  }
  0x58   :  { %749 = vperm.xlu1 %1210, %v687_v20  }
  0x5b   :  { %754 = vperm.xlu0 %1209, %v688_v21  }
  0x5c   :  { %1111 = vmatmul.mubr.msk.bf16.gmra.mrb[12].mxu0 %vm209_vm0, %v1218_v19  ;;  %759 = vperm.xlu1 %1210, %v689_v22  }
  0x5f   :  { %764 = vperm.xlu0 %1209, %v690_v23  }
  0x60   :  { %769 = vperm.xlu1 %1210, %v691_v24  }
  0x63   :  { %945 = vperm.xlu0 %1209, %v942_v25  }
  0x82   :  { %v92_v27 = vpop.permute.xlu0 %91 }
  0x83   :  { %v102_v28 = vpop.permute.xlu1 %101 }
  0x86   :  { %v97_v29 = vpop.permute.xlu0 %96 }
  0x87   :  { %v107_v30 = vpop.permute.xlu1 %106 }
  0x8a   :  { %v112_v31 = vpop.permute.xlu0 %111 }
  0x8b   :  { %v117_v32 = vpop.permute.xlu1 %116 }
  0x8e   :  { %v122_v33 = vpop.permute.xlu0 %121 }
  0x8f   :  { %v127_v37 = vpop.permute.xlu1 %126 }
  0x92   :  { %v132_v45 = vpop.permute.xlu0 %131 }
  0x93   :  { %v137_v49 = vpop.permute.xlu1 %136 }
  0x96   :  { %v142_v58 = vpop.permute.xlu0 %141 }
  0x97   :  { %v147_v62 = vpop.permute.xlu1 %146 }
  0x9a   :  { %v152_v6 = vpop.permute.xlu0 %151 }
  0x9b   :  { %v157_v11 = vpop.permute.xlu1 %156 }
  0x9e   :  { %v162_v18 = vpop.permute.xlu0 %161 }
  0x9f   :  { %v167_v23 = vpop.permute.xlu1 %166 }
 0x117   :  { %v1100_v34 = vpop.f32.mrb[0].mxu0 }
 0x118   :  { %v301_v35 = vadd.f32 %v1100_v34, %v102_v28  ;;  %v292_v36 = vpop.f32.mrb[1].mxu0 }
 0x119   :  { %v293_v38 = vadd.f32 %v292_v36, %v92_v27  ;;  %v1101_v39 = vpop.f32.mrb[2].mxu0  ;;  %v1221_v36 = vld [vmem:[%s1600_s3 + $0x10] sm:$0xff]  }
 0x11a   :  { %v304_v40 = vadd.f32 %v1101_v39, %v107_v30  ;;  %v295_v41 = vpop.f32.mrb[3].mxu0  ;;  %v357_v43 = vmax.f32 %v301_v35, 0.0  ;;  %v1220_v35 = vld [vmem:[%s1600_s3 + $0x8] sm:$0xff]  }
 0x11b   :  { %v296_v42 = vadd.f32 %v295_v41, %v97_v29  ;;  %v355_v46 = vmax.f32 %v293_v38, 0.0  ;;  %v1223_v38 = vld [vmem:[%s1600_s3 + $0x20] sm:$0xff]   ;;  %v1224_v39 = vld [vmem:[%s1600_s3 + $0x28] sm:$0xff]   ;;  %v1226_v41 = vld [vmem:[%s1600_s3 + $0x38] sm:$0xff]  }
 0x11c   :  { %v358_v44 = vmax.f32 %v304_v40, 0.0  ;;  %v1225_v40 = vld [vmem:[%s1600_s3 + $0x30] sm:$0xff]  }
 0x11d   :  { %v356_v47 = vmax.f32 %v296_v42, 0.0  ;;  %v1227_v42 = vld [vmem:[%s1601_s5] sm:$0xff]  }
 0x11e   :  { %v372_v48 = vpack.c.bf16 %v358_v44, %v357_v43  ;;  %v414_v43 = vpop.permute.xlu0 %413  ;;  %v419_v44 = vpop.permute.xlu1 %418 }
 0x11f   :  { %v1104_v50 = vpop.f32.mrb[4].mxu0  ;;  %v371_v51 = vpack.c.bf16 %v356_v47, %v355_v46 }
 0x120   :  { %v317_v52 = vadd.f32 %v1104_v50, %v122_v33  ;;  %v308_v53 = vpop.f32.mrb[5].mxu0 }
 0x121   :  { %v309_v54 = vadd.f32 %v308_v53, %v112_v31  ;;  %v1105_v55 = vpop.f32.mrb[6].mxu0  ;;  %1114 = vmatprep.subr.bf16.mxu1 %v371_v51 }
 0x122   :  { %v320_v56 = vadd.f32 %v1105_v55, %v127_v37  ;;  %v311_v57 = vpop.f32.mrb[7].mxu0  ;;  %1115 = vmatpush3.bf16.msra.mxu1 %v371_v51  ;;  %v361_v60 = vmax.f32 %v317_v52, 0.0  ;;  %v1222_v37 = vld [vmem:[%s1600_s3 + $0x18] sm:$0xff]   ;;  %v429_v46 = vpop.permute.xlu1 %428 }
 0x123   :  { %v312_v59 = vadd.f32 %v311_v57, %v117_v32  ;;  %1116 = vmatprep.subr.bf16.mxu1 %v372_v48  ;;  %v359_v63 = vmax.f32 %v309_v54, 0.0 }
 0x124   :  { %v362_v61 = vmax.f32 %v320_v56, 0.0 }
 0x125   :  { %v360_v0 = vmax.f32 %v312_v59, 0.0 }
 0x126   :  { %v374_v1 = vpack.c.bf16 %v362_v61, %v361_v60  ;;  %1117 = vmatpush3.bf16.msra.mxu1 %v372_v48  ;;  %v439_v48 = vpop.permute.xlu1 %438 }
 0x127   :  { %v373_v2 = vpack.c.bf16 %v360_v0, %v359_v63  ;;  %v1108_v3 = vpop.f32.mrb[8].mxu0 }
 0x128   :  { %v333_v4 = vadd.f32 %v1108_v3, %v142_v58  ;;  %v324_v5 = vpop.f32.mrb[9].mxu0 }
 0x129   :  { %v325_v7 = vadd.f32 %v324_v5, %v132_v45  ;;  %v1109_v8 = vpop.f32.mrb[10].mxu0  ;;  %1118 = vmatprep.subr.bf16.mxu1 %v373_v2  ;;  %v424_v45 = vpop.permute.xlu0 %423 }
 0x12a   :  { %v336_v9 = vadd.f32 %v1109_v8, %v147_v62  ;;  %v327_v10 = vpop.f32.mrb[11].mxu0  ;;  %1119 = vmatpush3.bf16.msra.mxu1 %v373_v2  ;;  %v365_v13 = vmax.f32 %v333_v4, 0.0  ;;  %v449_v53 = vpop.permute.xlu1 %448 }
 0x12b   :  { %v328_v12 = vadd.f32 %v327_v10, %v137_v49  ;;  %1120 = vmatprep.subr.bf16.mxu1 %v374_v1  ;;  %v363_v15 = vmax.f32 %v325_v7, 0.0 }
 0x12c   :  { %v366_v14 = vmax.f32 %v336_v9, 0.0 }
 0x12d   :  { %v364_v16 = vmax.f32 %v328_v12, 0.0  ;;  %v434_v47 = vpop.permute.xlu0 %433 }
 0x12e   :  { %v376_v17 = vpack.c.bf16 %v366_v14, %v365_v13  ;;  %1121 = vmatpush3.bf16.msra.mxu1 %v374_v1  ;;  %v459_v1 = vpop.permute.xlu1 %458 }
 0x12f   :  { %v375_v19 = vpack.c.bf16 %v364_v16, %v363_v15  ;;  %v1112_v20 = vpop.f32.mrb[12].mxu0 }
 0x130   :  { %v349_v21 = vadd.f32 %v1112_v20, %v162_v18  ;;  %v340_v22 = vpop.f32.mrb[13].mxu0 }
 0x131   :  { %v341_v24 = vadd.f32 %v340_v22, %v152_v6  ;;  %v1113_v25 = vpop.f32.mrb[14].mxu0  ;;  %1122 = vmatprep.subr.bf16.mxu1 %v375_v19  ;;  %v444_v49 = vpop.permute.xlu0 %443 }
 0x132   :  { %v352_v26 = vadd.f32 %v1113_v25, %v167_v23  ;;  %v343_v27 = vpop.f32.mrb[15].mxu0  ;;  %1123 = vmatpush3.bf16.msra.mxu1 %v375_v19  ;;  %v369_v29 = vmax.f32 %v349_v21, 0.0  ;;  %v469_v14 = vpop.permute.xlu1 %468 }
 0x133   :  { %v344_v28 = vadd.f32 %v343_v27, %v157_v11  ;;  %1124 = vmatprep.subr.bf16.mxu1 %v376_v17  ;;  %v367_v31 = vmax.f32 %v341_v24, 0.0 }
 0x134   :  { %v370_v30 = vmax.f32 %v352_v26, 0.0 }
 0x135   :  { %v368_v32 = vmax.f32 %v344_v28, 0.0  ;;  %v454_v61 = vpop.permute.xlu0 %453 }
 0x136   :  { %v378_v33 = vpack.c.bf16 %v370_v30, %v369_v29  ;;  %1125 = vmatpush3.bf16.msra.mxu1 %v376_v17  ;;  %v479_v27 = vpop.permute.xlu1 %478 }
 0x137   :  { %v377_v34 = vpack.c.bf16 %v368_v32, %v367_v31 }
 0x139   :  { %1126 = vmatprep.subr.bf16.mxu1 %v377_v34  ;;  %v464_v10 = vpop.permute.xlu0 %463 }
 0x13a   :  { %1127 = vmatpush3.bf16.msra.mxu1 %v377_v34 }
 0x13b   :  { %1128 = vmatprep.subr.bf16.mxu1 %v378_v33 }
 0x13d   :  { %v474_v22 = vpop.permute.xlu0 %473 }
 0x13e   :  { %1129 = vmatpush3.bf16.msra.mxu1 %v378_v33 }
 0x141   :  { %1131 = vmatmul.mubr.bf16.vlgmr.msra.gmra.mrb[0].mxu1 %v1220_v35  ;;  %v484_v34 = vpop.permute.xlu0 %483 }
 0x142   :  { %1134 = vmatprep.mubr.bf16.mxu1 %v1221_v36 }
 0x149   :  { %1135 = vmatmul.mubr.bf16.gmra.mrb[4].mxu1 %v1222_v37 }
 0x14a   :  { %1138 = vmatprep.mubr.bf16.mxu1 %v1223_v38 }
 0x151   :  { %1139 = vmatmul.mubr.bf16.gmra.mrb[8].mxu1 %v1224_v39  ;;  %v489_v39 = vpop.permute.xlu1 %488 }
 0x152   :  { %1142 = vmatprep.mubr.bf16.mxu1 %v1225_v40 }
 0x159   :  { %1143 = vmatmul.mubr.bf16.gmra.mrb[12].mxu1 %v1226_v41 }
 0x15a   :  { %1162 = vmatprep.mubr.bf16.mxu1 %v1227_v42 }
 0x214   :  { %v1132_v50 = vpop.f32.mrb[0].mxu1 }
 0x215   :  { %v582_v51 = vadd.f32 %v1132_v50, %v424_v45  ;;  %v573_v52 = vpop.f32.mrb[1].mxu1 }
 0x216   :  { %v574_v54 = vadd.f32 %v573_v52, %v414_v43  ;;  %v1133_v55 = vpop.f32.mrb[2].mxu1  ;;  %v1229_v52 = vld [vmem:[%s1601_s5 + $0x10] sm:$0xff]  }
 0x217   :  { %v585_v56 = vadd.f32 %v1133_v55, %v429_v46  ;;  %v576_v57 = vpop.f32.mrb[3].mxu1  ;;  %v638_v59 = vmax.f32 %v582_v51, 0.0  ;;  %v1228_v51 = vld [vmem:[%s1601_s5 + $0x8] sm:$0xff]  }
 0x218   :  { %v577_v58 = vadd.f32 %v576_v57, %v419_v44  ;;  %v636_v62 = vmax.f32 %v574_v54, 0.0  ;;  %v1231_v54 = vld [vmem:[%s1601_s5 + $0x20] sm:$0xff]   ;;  %v1232_v55 = vld [vmem:[%s1601_s5 + $0x28] sm:$0xff]   ;;  %v1234_v57 = vld [vmem:[%s1601_s5 + $0x38] sm:$0xff]  }
 0x219   :  { %v639_v60 = vmax.f32 %v585_v56, 0.0  ;;  %v1233_v56 = vld [vmem:[%s1601_s5 + $0x30] sm:$0xff]  }
 0x21a   :  { %v637_v63 = vmax.f32 %v577_v58, 0.0  ;;  %v1236_v58 = vmov 0.0  }
 0x21b   :  { %v653_v0 = vpack.c.bf16 %v639_v60, %v638_v59  ;;  %1178 = vmatprep.subr.bf16.mxu0 %v1236_v58  ;;  %1194 = vmatprep.mubr.msk.bf16.mxu0 %vm1237_vm1, %v1236_v58  ;;  %v695_v59 = vpop.permute.xlu0 %694  ;;  %v700_v60 = vpop.permute.xlu1 %699 }
 0x21c   :  { %v652_v2 = vpack.c.bf16 %v637_v63, %v636_v62  ;;  %v1136_v3 = vpop.f32.mrb[4].mxu1 }
 0x21d   :  { %v598_v4 = vadd.f32 %v1136_v3, %v444_v49  ;;  %v589_v5 = vpop.f32.mrb[5].mxu1 }
 0x21e   :  { %v590_v6 = vadd.f32 %v589_v5, %v434_v47  ;;  %v1137_v7 = vpop.f32.mrb[6].mxu1  ;;  %1146 = vmatprep.subr.bf16.mxu1 %v652_v2 }
 0x21f   :  { %v601_v8 = vadd.f32 %v1137_v7, %v449_v53  ;;  %v592_v9 = vpop.f32.mrb[7].mxu1  ;;  %1147 = vmatpush3.bf16.msra.mxu1 %v652_v2  ;;  %v642_v12 = vmax.f32 %v598_v4, 0.0  ;;  %v1230_v53 = vld [vmem:[%s1601_s5 + $0x18] sm:$0xff]   ;;  %v710_v62 = vpop.permute.xlu1 %709 }
 0x220   :  { %v593_v11 = vadd.f32 %v592_v9, %v439_v48  ;;  %1148 = vmatprep.subr.bf16.mxu1 %v653_v0  ;;  %v640_v15 = vmax.f32 %v590_v6, 0.0 }
 0x221   :  { %v643_v13 = vmax.f32 %v601_v8, 0.0 }
 0x222   :  { %v641_v16 = vmax.f32 %v593_v11, 0.0 }
 0x223   :  { %v655_v17 = vpack.c.bf16 %v643_v13, %v642_v12  ;;  %1149 = vmatpush3.bf16.msra.mxu1 %v653_v0  ;;  %v720_v0 = vpop.permute.xlu1 %719 }
 0x224   :  { %v654_v18 = vpack.c.bf16 %v641_v16, %v640_v15  ;;  %v1140_v19 = vpop.f32.mrb[8].mxu1 }
 0x225   :  { %v614_v20 = vadd.f32 %v1140_v19, %v464_v10  ;;  %v605_v21 = vpop.f32.mrb[9].mxu1 }
 0x226   :  { %v606_v23 = vadd.f32 %v605_v21, %v454_v61  ;;  %v1141_v24 = vpop.f32.mrb[10].mxu1  ;;  %1150 = vmatprep.subr.bf16.mxu1 %v654_v18  ;;  %v705_v61 = vpop.permute.xlu0 %704 }
 0x227   :  { %v617_v25 = vadd.f32 %v1141_v24, %v469_v14  ;;  %v608_v26 = vpop.f32.mrb[11].mxu1  ;;  %1151 = vmatpush3.bf16.msra.mxu1 %v654_v18  ;;  %v646_v29 = vmax.f32 %v614_v20, 0.0  ;;  %v730_v5 = vpop.permute.xlu1 %729 }
 0x228   :  { %v609_v28 = vadd.f32 %v608_v26, %v459_v1  ;;  %1152 = vmatprep.subr.bf16.mxu1 %v655_v17  ;;  %v644_v31 = vmax.f32 %v606_v23, 0.0 }
 0x229   :  { %v647_v30 = vmax.f32 %v617_v25, 0.0 }
 0x22a   :  { %v645_v32 = vmax.f32 %v609_v28, 0.0  ;;  %v715_v63 = vpop.permute.xlu0 %714 }
 0x22b   :  { %v657_v33 = vpack.c.bf16 %v647_v30, %v646_v29  ;;  %1153 = vmatpush3.bf16.msra.mxu1 %v655_v17  ;;  %v740_v17 = vpop.permute.xlu1 %739 }
 0x22c   :  { %v656_v35 = vpack.c.bf16 %v645_v32, %v644_v31  ;;  %v1144_v36 = vpop.f32.mrb[12].mxu1 }
 0x22d   :  { %v630_v37 = vadd.f32 %v1144_v36, %v484_v34  ;;  %v621_v38 = vpop.f32.mrb[13].mxu1 }
 0x22e   :  { %v622_v40 = vadd.f32 %v621_v38, %v474_v22  ;;  %v1145_v41 = vpop.f32.mrb[14].mxu1  ;;  %1154 = vmatprep.subr.bf16.mxu1 %v656_v35  ;;  %v725_v1 = vpop.permute.xlu0 %724 }
 0x22f   :  { %v633_v42 = vadd.f32 %v1145_v41, %v489_v39  ;;  %v624_v43 = vpop.f32.mrb[15].mxu1  ;;  %1155 = vmatpush3.bf16.msra.mxu1 %v656_v35  ;;  %v650_v45 = vmax.f32 %v630_v37, 0.0  ;;  %v750_v30 = vpop.permute.xlu1 %749 }
 0x230   :  { %v625_v44 = vadd.f32 %v624_v43, %v479_v27  ;;  %1156 = vmatprep.subr.bf16.mxu1 %v657_v33  ;;  %v648_v47 = vmax.f32 %v622_v40, 0.0 }
 0x231   :  { %v651_v46 = vmax.f32 %v633_v42, 0.0 }
 0x232   :  { %v649_v48 = vmax.f32 %v625_v44, 0.0  ;;  %v735_v13 = vpop.permute.xlu0 %734 }
 0x233   :  { %v659_v49 = vpack.c.bf16 %v651_v46, %v650_v45  ;;  %1157 = vmatpush3.bf16.msra.mxu1 %v657_v33  ;;  %v760_v43 = vpop.permute.xlu1 %759 }
 0x234   :  { %v658_v50 = vpack.c.bf16 %v649_v48, %v648_v47 }
 0x236   :  { %1158 = vmatprep.subr.bf16.mxu1 %v658_v50  ;;  %v745_v26 = vpop.permute.xlu0 %744 }
 0x237   :  { %1159 = vmatpush3.bf16.msra.mxu1 %v658_v50 }
 0x238   :  { %1160 = vmatprep.subr.bf16.mxu1 %v659_v49 }
 0x23a   :  { %v755_v38 = vpop.permute.xlu0 %754 }
 0x23b   :  { %1161 = vmatpush3.bf16.msra.mxu1 %v659_v49 }
 0x23e   :  { %1163 = vmatmul.mubr.bf16.vlgmr.msra.gmra.mrb[16].mxu1 %v1228_v51  ;;  %v765_v50 = vpop.permute.xlu0 %764 }
 0x23f   :  { %1166 = vmatprep.mubr.bf16.mxu1 %v1229_v52 }
 0x246   :  { %1167 = vmatmul.mubr.bf16.gmra.mrb[20].mxu1 %v1230_v53 }
 0x247   :  { %1170 = vmatprep.mubr.bf16.mxu1 %v1231_v54 }
 0x24e   :  { %1171 = vmatmul.mubr.bf16.gmra.mrb[24].mxu1 %v1232_v55  ;;  %v770_v55 = vpop.permute.xlu1 %769 }
 0x24f   :  { %1174 = vmatprep.mubr.bf16.mxu1 %v1233_v56 }
 0x256   :  { %1175 = vmatmul.mubr.bf16.gmra.mrb[28].mxu1 %v1234_v57 }
 0x311   :  { %v1164_v2 = vpop.f32.mrb[16].mxu1 }
 0x312   :  { %v863_v3 = vadd.f32 %v1164_v2, %v705_v61  ;;  %v854_v4 = vpop.f32.mrb[17].mxu1 }
 0x313   :  { %v855_v6 = vadd.f32 %v854_v4, %v695_v59  ;;  %v1165_v7 = vpop.f32.mrb[18].mxu1  ;;  %v941_v4 = vld [vmem:[%s1602_s7] sm:$0xf] }
 0x314   :  { %v866_v8 = vadd.f32 %v1165_v7, %v710_v62  ;;  %v857_v9 = vpop.f32.mrb[19].mxu1  ;;  %v919_v11 = vmax.f32 %v863_v3, 0.0 }
 0x315   :  { %v858_v10 = vadd.f32 %v857_v9, %v700_v60  ;;  %v917_v14 = vmax.f32 %v855_v6, 0.0 }
 0x316   :  { %v920_v12 = vmax.f32 %v866_v8, 0.0 }
 0x317   :  { %v918_v15 = vmax.f32 %v858_v10, 0.0 }
 0x318   :  { %v934_v16 = vpack.c.bf16 %v920_v12, %v919_v11 }
 0x319   :  { %v933_v18 = vpack.c.bf16 %v918_v15, %v917_v14  ;;  %v1168_v19 = vpop.f32.mrb[20].mxu1 }
 0x31a   :  { %v879_v20 = vadd.f32 %v1168_v19, %v725_v1  ;;  %v870_v21 = vpop.f32.mrb[21].mxu1 }
 0x31b   :  { %v871_v22 = vadd.f32 %v870_v21, %v715_v63  ;;  %v1169_v23 = vpop.f32.mrb[22].mxu1  ;;  %1179 = vmatpush3.bf16.msra.mxu0 %v933_v18 }
 0x31c   :  { %v882_v24 = vadd.f32 %v1169_v23, %v730_v5  ;;  %v873_v25 = vpop.f32.mrb[23].mxu1  ;;  %1180 = vmatprep.subr.bf16.mxu0 %v1236_v58  ;;  %v923_v28 = vmax.f32 %v879_v20, 0.0  ;;  %v946_v5 = vpop.permute.xlu0 %945 }
 0x31d   :  { %v874_v27 = vadd.f32 %v873_v25, %v720_v0  ;;  %v921_v31 = vmax.f32 %v871_v22, 0.0 }
 0x31e   :  { %v924_v29 = vmax.f32 %v882_v24, 0.0 }
 0x31f   :  { %v922_v32 = vmax.f32 %v874_v27, 0.0  ;;  %1181 = vmatpush3.bf16.msra.mxu0 %v934_v16 }
 0x320   :  { %v936_v33 = vpack.c.bf16 %v924_v29, %v923_v28  ;;  %1182 = vmatprep.subr.bf16.mxu0 %v1236_v58 }
 0x321   :  { %v935_v34 = vpack.c.bf16 %v922_v32, %v921_v31  ;;  %v1172_v35 = vpop.f32.mrb[24].mxu1 }
 0x322   :  { %v895_v36 = vadd.f32 %v1172_v35, %v745_v26  ;;  %v886_v37 = vpop.f32.mrb[25].mxu1 }
 0x323   :  { %v887_v39 = vadd.f32 %v886_v37, %v735_v13  ;;  %v1173_v40 = vpop.f32.mrb[26].mxu1  ;;  %1183 = vmatpush3.bf16.msra.mxu0 %v935_v34 }
 0x324   :  { %v898_v41 = vadd.f32 %v1173_v40, %v750_v30  ;;  %v889_v42 = vpop.f32.mrb[27].mxu1  ;;  %1184 = vmatprep.subr.bf16.mxu0 %v1236_v58  ;;  %v927_v45 = vmax.f32 %v895_v36, 0.0 }
 0x325   :  { %v890_v44 = vadd.f32 %v889_v42, %v740_v17  ;;  %v925_v47 = vmax.f32 %v887_v39, 0.0 }
 0x326   :  { %v928_v46 = vmax.f32 %v898_v41, 0.0 }
 0x327   :  { %v926_v48 = vmax.f32 %v890_v44, 0.0  ;;  %1185 = vmatpush3.bf16.msra.mxu0 %v936_v33 }
 0x328   :  { %v938_v49 = vpack.c.bf16 %v928_v46, %v927_v45  ;;  %1186 = vmatprep.subr.bf16.mxu0 %v1236_v58 }
 0x329   :  { %v937_v51 = vpack.c.bf16 %v926_v48, %v925_v47  ;;  %v1176_v52 = vpop.f32.mrb[28].mxu1 }
 0x32a   :  { %v911_v53 = vadd.f32 %v1176_v52, %v765_v50  ;;  %v902_v54 = vpop.f32.mrb[29].mxu1 }
 0x32b   :  { %v903_v56 = vadd.f32 %v902_v54, %v755_v38  ;;  %v1177_v57 = vpop.f32.mrb[30].mxu1  ;;  %1187 = vmatpush3.bf16.msra.mxu0 %v937_v51 }
 0x32c   :  { %v914_v59 = vadd.f32 %v1177_v57, %v770_v55  ;;  %v905_v60 = vpop.f32.mrb[31].mxu1  ;;  %1188 = vmatprep.subr.bf16.mxu0 %v1236_v58  ;;  %v931_v62 = vmax.f32 %v911_v53, 0.0 }
 0x32d   :  { %v906_v61 = vadd.f32 %v905_v60, %v760_v43  ;;  %v929_v0 = vmax.f32 %v903_v56, 0.0 }
 0x32e   :  { %v932_v63 = vmax.f32 %v914_v59, 0.0 }
 0x32f   :  { %v930_v1 = vmax.f32 %v906_v61, 0.0  ;;  %1189 = vmatpush3.bf16.msra.mxu0 %v938_v49 }
 0x330   :  { %v940_v2 = vpack.c.bf16 %v932_v63, %v931_v62  ;;  %1190 = vmatprep.subr.bf16.mxu0 %v1236_v58 }
 0x331   :  { %v939_v3 = vpack.c.bf16 %v930_v1, %v929_v0 }
 0x333   :  { %1191 = vmatpush3.bf16.msra.mxu0 %v939_v3 }
 0x334   :  { %1192 = vmatprep.subr.bf16.mxu0 %v1236_v58 }
 0x337   :  { %1193 = vmatpush3.bf16.msra.mxu0 %v940_v2 }
 0x33a   :  { %1195 = vmatmul.mubr.bf16.vlgmr.msra.gmra.mrb[16].mxu0 %v941_v4 }
 0x40d   :  { %v982_v6 = vpop.f32.mrb[16].mxu0 }
 0x40e   :  { %v983_v7 = vadd.f32 %v982_v6, %v946_v5  ;;  %v1196_v8 = vpop.f32.mrb[17].mxu0 }
 0x40f   :  { %v985_v9 = vpop.f32.mrb[18].mxu0 }
 0x410   :  { %988 = vst [vmem:[%s1603_s9] sm:$0xff] %v983_v7  ;;  %v1197_v10 = vpop.f32.mrb[19].mxu0 }

</bundles_post_ra>
